<compile_context>
chip_gen: v5e
topology: v5e:2x2
jax: 0.10.0
libtpu: 0.0.40
codegen_flags: <defaults>
</compile_context>

<pallas_src>
import functools

import jax
import jax.numpy as jnp
from jax.experimental import pallas as pl
from jax.experimental.pallas import tpu as pltpu

_LANES = 128
_MAX_BLOCK_ROWS = 2048          # 2048 x 128 x 4B = 1 MiB per f32 tile per input
_EPS = 1e-7


def _dice_partial_kernel(p_ref, m_ref, out_ref, *, total_rows, block_rows,
                         blocks_per_split, needs_mask):
    """Accumulate per-(sublane, lane) partial sums of p*m and m*m.

    p_ref, m_ref : (block_rows, 128) VMEM tiles (original input dtype)
    out_ref      : (1, 2, 8, 128) f32 VMEM block; acts as the accumulator,
                   resident across the inner ("arbitrary") grid axis.
                   Row 0 holds sum(p*m) partials, row 1 holds sum(m*m).
    """
    s = pl.program_id(0)
    j = pl.program_id(1)

    @pl.when(j == 0)
    def _init():
        out_ref[...] = jnp.zeros_like(out_ref)

    p = p_ref[...].astype(jnp.float32)   # probs = output.float()
    m = m_ref[...].astype(jnp.float32)   # mask  = mask.float()

    if needs_mask:
        # Rows past the logical extent (partial edge block / dummy blocks of
        # an uneven core split) may contain garbage -> zero them out.
        base_row = (s * blocks_per_split + j) * block_rows
        row_ids = base_row + jax.lax.broadcasted_iota(
            jnp.int32, (block_rows, 1), 0)
        valid = row_ids < total_rows
        p = jnp.where(valid, p, 0.0)
        m = jnp.where(valid, m, 0.0)

    # Pure-VPU per-step accumulation into an (8, 128) vreg-shaped slab; the
    # cross-lane reduce happens once, outside the kernel, on a tiny array.
    pm = (p * m).reshape(block_rows // 8, 8, _LANES).sum(axis=0)
    mm = (m * m).reshape(block_rows // 8, 8, _LANES).sum(axis=0)
    out_ref[0, 0, :, :] += pm
    out_ref[0, 1, :, :] += mm


def _min_sublanes(dtype):
    # Native sublane tiling: 8 for 4-byte dtypes, 16 for 2-byte, 32 for 1-byte.
    return max(8, 32 // jnp.dtype(dtype).itemsize)


def _to_lane_slab(x, sub):
    """Flatten row-major and reshape into a lane-dense (rows, 128) slab.

    Keeps the original dtype (no f32 upcast -> no extra HBM traffic).  Only
    pads when the element count is not already tile-divisible (the zero pad
    does not perturb either sum).
    """
    flat = x.reshape(-1)
    n = flat.shape[0]
    tile = _LANES * sub
    pad = (-n) % tile
    if pad:
        # TODO(synk): this pad costs one extra HBM pass for non-tile-divisible
        # sizes; could be avoided by handling a tiny tail block separately.
        flat = jnp.pad(flat, (0, pad))
    return flat.reshape(-1, _LANES)


@jax.jit
def dice_loss_multiclass(output, mask):
    """Pallas implementation of DICELossMultiClass.forward(output, mask)."""
    sub = max(_min_sublanes(output.dtype), _min_sublanes(mask.dtype))
    p2d = _to_lane_slab(output, sub)
    m2d = _to_lane_slab(mask, sub)
    rows = p2d.shape[0]                       # static Python int under jit

    block_rows = min(_MAX_BLOCK_ROWS, rows)   # multiple of `sub`
    blocks_total = -(-rows // block_rows)
    num_splits = 2 if blocks_total >= 2 else 1    # 2-TC (v7x megacore) split
    blocks_per_split = -(-blocks_total // num_splits)
    needs_mask = (num_splits * blocks_per_split * block_rows != rows)

    def in_index_map(s, j):
        jg = s * blocks_per_split + j
        # Clamp dummy trailing blocks of an uneven split to a valid block;
        # their contribution is masked to zero inside the kernel.
        return (jnp.minimum(jg, blocks_total - 1), 0)

    kernel = functools.partial(
        _dice_partial_kernel,
        total_rows=rows,
        block_rows=block_rows,
        blocks_per_split=blocks_per_split,
        needs_mask=needs_mask,
    )

    partials = pl.pallas_call(
        kernel,
        out_shape=jax.ShapeDtypeStruct((num_splits, 2, 8, _LANES), jnp.float32),
        grid_spec=pltpu.PrefetchScalarGridSpec(
            num_scalar_prefetch=0,
            grid=(num_splits, blocks_per_split),
            in_specs=[
                pl.BlockSpec((block_rows, _LANES), in_index_map),
                pl.BlockSpec((block_rows, _LANES), in_index_map),
            ],
            out_specs=pl.BlockSpec((1, 2, 8, _LANES),
                                   lambda s, j: (s, 0, 0, 0)),
        ),
        compiler_params=pltpu.CompilerParams(
            dimension_semantics=("parallel", "arbitrary"),
        ),
    )(p2d, m2d)

    # Tiny epilogue: combine per-core / per-lane partials and form the loss.
    sum_pm = jnp.sum(partials[:, 0])      # num1 (== den1)
    sum_mm = jnp.sum(partials[:, 1])      # den2
    eps = jnp.float32(_EPS)
    dice = 2.0 * (sum_pm + eps) / (sum_pm + sum_mm + eps)
    # dice has "batch" size 1 in the reference -> loss = 1 - dice
    return jnp.float32(1.0) - dice


def _reference(output, mask):
    probs = output.astype(jnp.float32)
    m = mask.astype(jnp.float32)
    num1 = jnp.sum(probs * m)
    den1 = num1
    den2 = jnp.sum(m * m)
    eps = jnp.float32(_EPS)
    dice = 2.0 * (num1 + eps) / (den1 + den2 + eps)
    return 1.0 - dice


if __name__ == "__main__":
    key = jax.random.PRNGKey(0)
    k1, k2 = jax.random.split(key)
    # NCHW, small shapes: batch=2, channels=4, spatial=16
    output = jax.nn.sigmoid(jax.random.normal(k1, (2, 4, 16, 16), jnp.float32))
    mask = (jax.random.uniform(k2, (2, 4, 16, 16)) > 0.5).astype(jnp.float32)

    loss = dice_loss_multiclass(output, mask)
    loss = jax.block_until_ready(loss)

    ref = _reference(output, mask)
    assert jnp.allclose(loss, ref, rtol=1e-5, atol=1e-6), (loss, ref)
    print("KERNEL_OK")
</pallas_src>

<mosaic_0001>
module attributes {stable_mosaic.version = 11 : i64} {
  func.func @_dice_partial_kernel(%arg0: i32, %arg1: i32, %arg2: memref<16x128xf32, #tpu.memory_space<vmem>>, %arg3: memref<16x128xf32, #tpu.memory_space<vmem>>, %arg4: memref<1x2x8x128xf32, #tpu.memory_space<vmem>>) attributes {dimension_semantics = [#tpu.dimension_semantics<parallel>, #tpu.dimension_semantics<arbitrary>], iteration_bounds = array<i64: 1, 1>, scalar_prefetch = 0 : i64, scratch_operands = 0 : i64, tpu.core_type = #tpu.core_type<tc>, window_params = [{transform_indices = @transform_0, window_bounds = array<i64: 16, 128>}, {transform_indices = @transform_1, window_bounds = array<i64: 16, 128>}, {transform_indices = @transform_2, window_bounds = array<i64: 1, 2, 8, 128>}]} {
    %c0_i32 = arith.constant 0 : i32
    %0 = arith.cmpi eq, %arg1, %c0_i32 : i32
    %1 = arith.extui %0 : i1 to i32
    %c0_i32_0 = arith.constant 0 : i32
    %2 = arith.cmpi ne, %1, %c0_i32_0 : i32
    scf.if %2 {
      %cst_20 = arith.constant 0.000000e+00 : f32
      %23 = vector.broadcast %cst_20 : f32 to vector<1x2x8x128xf32>
      %c0_21 = arith.constant 0 : index
      %c0_22 = arith.constant 0 : index
      %c0_23 = arith.constant 0 : index
      %c0_24 = arith.constant 0 : index
      %24 = vector.load %arg4[%c0_21, %c0_22, %c0_23, %c0_24] : memref<1x2x8x128xf32, #tpu.memory_space<vmem>>, vector<1x2x8x128xf32>
      tpu.vector_store %arg4[%c0_21, %c0_22, %c0_23, %c0_24], %23 {strides = array<i32>} : memref<1x2x8x128xf32, #tpu.memory_space<vmem>>, vector<1x2x8x128xf32>,
    } else {
    }
    %c0 = arith.constant 0 : index
    %c0_1 = arith.constant 0 : index
    %3 = vector.load %arg2[%c0, %c0_1] : memref<16x128xf32, #tpu.memory_space<vmem>>, vector<16x128xf32>
    %c0_2 = arith.constant 0 : index
    %c0_3 = arith.constant 0 : index
    %4 = vector.load %arg3[%c0_2, %c0_3] : memref<16x128xf32, #tpu.memory_space<vmem>>, vector<16x128xf32>
    %5 = arith.mulf %3, %4 : vector<16x128xf32>
    %6 = vector.shape_cast %5 : vector<16x128xf32> to vector<2x8x128xf32>
    %cst = arith.constant dense<0.000000e+00> : vector<8x128xf32>
    %7 = vector.multi_reduction <add>, %6, %cst [0] : vector<2x8x128xf32> to vector<8x128xf32>
    %8 = arith.mulf %4, %4 : vector<16x128xf32>
    %9 = vector.shape_cast %8 : vector<16x128xf32> to vector<2x8x128xf32>
    %cst_4 = arith.constant dense<0.000000e+00> : vector<8x128xf32>
    %10 = vector.multi_reduction <add>, %9, %cst_4 [0] : vector<2x8x128xf32> to vector<8x128xf32>
    %c0_5 = arith.constant 0 : index
    %c0_6 = arith.constant 0 : index
    %c0_7 = arith.constant 0 : index
    %c0_8 = arith.constant 0 : index
    %11 = vector.load %arg4[%c0_5, %c0_6, %c0_7, %c0_8] : memref<1x2x8x128xf32, #tpu.memory_space<vmem>>, vector<1x1x8x128xf32>
    %12 = vector.shape_cast %11 : vector<1x1x8x128xf32> to vector<8x128xf32>
    %13 = arith.addf %12, %7 : vector<8x128xf32>
    %c0_9 = arith.constant 0 : index
    %c0_10 = arith.constant 0 : index
    %c0_11 = arith.constant 0 : index
    %c0_12 = arith.constant 0 : index
    %14 = vector.load %arg4[%c0_9, %c0_10, %c0_11, %c0_12] : memref<1x2x8x128xf32, #tpu.memory_space<vmem>>, vector<1x1x8x128xf32>
    %15 = vector.shape_cast %14 : vector<1x1x8x128xf32> to vector<8x128xf32>
    %16 = vector.shape_cast %13 : vector<8x128xf32> to vector<1x1x8x128xf32>
    tpu.vector_store %arg4[%c0_9, %c0_10, %c0_11, %c0_12], %16 {strides = array<i32>} : memref<1x2x8x128xf32, #tpu.memory_space<vmem>>, vector<1x1x8x128xf32>,
    %c0_13 = arith.constant 0 : index
    %c1 = arith.constant 1 : index
    %c0_14 = arith.constant 0 : index
    %c0_15 = arith.constant 0 : index
    %17 = vector.load %arg4[%c0_13, %c1, %c0_14, %c0_15] : memref<1x2x8x128xf32, #tpu.memory_space<vmem>>, vector<1x1x8x128xf32>
    %18 = vector.shape_cast %17 : vector<1x1x8x128xf32> to vector<8x128xf32>
    %19 = arith.addf %18, %10 : vector<8x128xf32>
    %c0_16 = arith.constant 0 : index
    %c1_17 = arith.constant 1 : index
    %c0_18 = arith.constant 0 : index
    %c0_19 = arith.constant 0 : index
    %20 = vector.load %arg4[%c0_16, %c1_17, %c0_18, %c0_19] : memref<1x2x8x128xf32, #tpu.memory_space<vmem>>, vector<1x1x8x128xf32>
    %21 = vector.shape_cast %20 : vector<1x1x8x128xf32> to vector<8x128xf32>
    %22 = vector.shape_cast %19 : vector<8x128xf32> to vector<1x1x8x128xf32>
    tpu.vector_store %arg4[%c0_16, %c1_17, %c0_18, %c0_19], %22 {strides = array<i32>} : memref<1x2x8x128xf32, #tpu.memory_space<vmem>>, vector<1x1x8x128xf32>,
    return
  }
  func.func @transform_0(%arg0: i32, %arg1: i32) -> (i32, i32) {
    %c1_i32 = arith.constant 1 : i32
    %0 = arith.muli %arg0, %c1_i32 : i32
    %1 = arith.addi %0, %arg1 : i32
    %c0_i32 = arith.constant 0 : i32
    %2 = arith.minsi %1, %c0_i32 : i32
    %c0_i32_0 = arith.constant 0 : i32
    %c0_i32_1 = arith.constant 0 : i32
    return %2, %c0_i32_0 : i32, i32
  }
  func.func @transform_1(%arg0: i32, %arg1: i32) -> (i32, i32) {
    %c1_i32 = arith.constant 1 : i32
    %0 = arith.muli %arg0, %c1_i32 : i32
    %1 = arith.addi %0, %arg1 : i32
    %c0_i32 = arith.constant 0 : i32
    %2 = arith.minsi %1, %c0_i32 : i32
    %c0_i32_0 = arith.constant 0 : i32
    %c0_i32_1 = arith.constant 0 : i32
    return %2, %c0_i32_0 : i32, i32
  }
  func.func @transform_2(%arg0: i32, %arg1: i32) -> (i32, i32, i32, i32) {
    %c0_i32 = arith.constant 0 : i32
    %c0_i32_0 = arith.constant 0 : i32
    %c0_i32_1 = arith.constant 0 : i32
    %c0_i32_2 = arith.constant 0 : i32
    return %arg0, %c0_i32, %c0_i32_0, %c0_i32_1 : i32, i32, i32, i32
  }
}

</mosaic_0001>

<bundles_post_ra>
// kernel: dice_loss_multiclass.1
= control target key start
LH: loop header
LB: loop body
LE: loop exit
PB: predicated region body
PF: predicated region fallthrough
CT: control target
= control target key end

     0   :  { %s150_s0 = inlined_call_operand.vmem [shape: f32[16,128], index: 0, kind: input, shape index: {}]   ;;  %s151_s1 = inlined_call_operand.vmem [shape: f32[16,128], index: 1, kind: input, shape index: {}]   ;;  %s152_s2 = inlined_call_operand.vmem [shape: f32[1,2,8,128], index: 2, kind: output, shape index: {}]  }
   0x1   :  { %v81_v0 = vld [vmem:[%s150_s0] sm:$0xff]  ;;  %v82_v1 = vld [vmem:[%s150_s0 + $0x8] sm:$0xff] }
   0x2   :  { %v83_v2 = vld [vmem:[%s151_s1] sm:$0xff]  ;;  %v84_v3 = vld [vmem:[%s151_s1 + $0x8] sm:$0xff] }
   0x3   :  { %v85_v4 = vmul.f32 %v83_v2, %v81_v0  ;;  %v88_v5 = vmul.f32 %v83_v2, %v83_v2  ;;  %v86_v6 = vmul.f32 %v84_v3, %v82_v1  ;;  %v89_v7 = vmul.f32 %v84_v3, %v84_v3 }
   0x5   :  { %v87_v8 = vadd.f32 %v86_v6, %v85_v4  ;;  %v90_v9 = vadd.f32 %v89_v7, %v88_v5 }
   0x7   :  { %93 = vst [vmem:[%s152_s2] sm:$0xff] %v87_v8 }
   0x8   :  { %115 = vst [vmem:[%s152_s2 + $0x8] sm:$0xff] %v90_v9 }

</bundles_post_ra>
